<compile_context>
chip_gen: v5e
topology: v5e:2x2
jax: 0.10.0
libtpu: 0.0.40
codegen_flags: <defaults>
</compile_context>

<pallas_src>
import jax
import jax.numpy as jnp
from jax.experimental import pallas as pl
from jax.experimental.pallas import tpu as pltpu

LANES = 128


def mlp_kernel(x_ref, w1_ref, b1_ref, w2_ref, b2_ref, o_ref):
    # x_ref:  (Din, C, 128) VMEM  -- batch on sublanes+lanes, features leading
    # w1_ref: (H*Din,)   SMEM  (row-major: w1[j, k] at j*Din + k)
    # b1_ref: (H,)       SMEM
    # w2_ref: (Dout*H,)  SMEM  (row-major: w2[o, j] at o*H + j)
    # b2_ref: (Dout,)    SMEM
    # o_ref:  (Dout, C, 128) VMEM
    din = x_ref.shape[0]
    hidden = b1_ref.shape[0]
    dout = b2_ref.shape[0]

    x = x_ref[...]
    if x.dtype != jnp.float32:
        x = x.astype(jnp.float32)

    # fc1 + sigmoid: each hidden feature is a dense (C, 128) slab built from
    # scalar-splat multiply-adds (VPU only), then one EUP sigmoid.
    h = []
    for j in range(hidden):                       # static unroll, H == 6
        acc = x[0] * w1_ref[j * din] + b1_ref[j]  # scalar splats, (C, 128)
        for k in range(1, din):                   # static unroll, Din == 6
            acc = acc + x[k] * w1_ref[j * din + k]
        h.append(jax.nn.sigmoid(acc))

    # fc2: accumulate over hidden features (no cross-lane reduce / XLU);
    # result is a lane-dense (C, 128) slab per output column.
    for o in range(dout):                         # static unroll, Dout == 1
        y = h[0] * w2_ref[o * hidden] + b2_ref[o]
        for j in range(1, hidden):
            y = y + h[j] * w2_ref[o * hidden + j]
        o_ref[o] = y.astype(o_ref.dtype)


def _cdiv(a, b):
    return -(-a // b)


def net_forward(x, w1, b1, w2, b2, *, tile_rows=4096, force_pallas=False):
    """x: (B, Din); w1: (H, Din); b1: (H,); w2: (Dout, H); b2: (Dout,)."""
    batch, din = x.shape
    hidden = w1.shape[0]
    dout = w2.shape[0]

    # Small-batch fallback: launch + DMA setup dominates, let XLA fuse it.
    if not force_pallas and batch < 2048:
        return jnp.dot(jax.nn.sigmoid(jnp.dot(x, w1.T) + b1), w2.T) + b2

    # --- batch-on-lanes layout ------------------------------------------
    # Rows are grouped into 128-wide lane chunks; each grid step processes
    # `c_per_tile` chunks (a (C, 128) slab per feature).
    c_per_tile = max(1, tile_rows // LANES)
    total_chunks = _cdiv(batch, LANES)
    if total_chunks <= c_per_tile:
        c_per_tile = total_chunks                 # single tile (full-dim block)
    else:
        c_per_tile = max(8, (c_per_tile // 8) * 8)          # sublane multiple
        total_chunks = _cdiv(total_chunks, c_per_tile) * c_per_tile
    padded_rows = total_chunks * LANES

    xp = x
    if padded_rows != batch:
        xp = jnp.pad(x, ((0, padded_rows - batch), (0, 0)))
    # (B, Din) -> (Din, chunks, 128): one-time layout plumbing in the wrapper.
    xt = xp.reshape(total_chunks, LANES, din).transpose(2, 0, 1)

    grid = (total_chunks // c_per_tile,)

    itemsize = jnp.dtype(x.dtype).itemsize
    cost = pl.CostEstimate(
        flops=2 * batch * (din * hidden + hidden * dout),
        transcendentals=batch * hidden,
        bytes_accessed=batch * din * itemsize
        + batch * dout * itemsize
        + (w1.size + b1.size + w2.size + b2.size) * 4,
    )

    out = pl.pallas_call(
        mlp_kernel,
        out_shape=jax.ShapeDtypeStruct((dout, total_chunks, LANES), x.dtype),
        grid=grid,
        in_specs=[
            # x: tiled along the chunk axis, features lead (grid-invariant dim).
            pl.BlockSpec((din, c_per_tile, LANES), lambda i: (0, i, 0)),
            # weights / biases: tiny, flattened, live in SMEM as scalars.
            pl.BlockSpec(memory_space=pltpu.MemorySpace.SMEM),
            pl.BlockSpec(memory_space=pltpu.MemorySpace.SMEM),
            pl.BlockSpec(memory_space=pltpu.MemorySpace.SMEM),
            pl.BlockSpec(memory_space=pltpu.MemorySpace.SMEM),
        ],
        out_specs=pl.BlockSpec((dout, c_per_tile, LANES), lambda i: (0, i, 0)),
        compiler_params=pltpu.CompilerParams(
            dimension_semantics=("parallel",),     # TC sharding on v7x
            vmem_limit_bytes=32 * 1024 * 1024,     # explicit v7x-safe budget
        ),
        cost_estimate=cost,
    )(
        xt,
        w1.reshape(-1),
        b1.reshape(-1),
        w2.reshape(-1),
        b2.reshape(-1),
    )

    # (Dout, chunks, 128) -> (padded_rows, Dout) -> (B, Dout)
    y = out.transpose(1, 2, 0).reshape(padded_rows, dout)
    return y[:batch]


if __name__ == "__main__":
    input_dim, hidden_size, output_dim = 6, 6, 1

    key = jax.random.PRNGKey(0)
    kx, kw1, kb1, kw2, kb2 = jax.random.split(key, 5)

    # PyTorch-shaped parameters: weight is (out_features, in_features).
    w1 = jax.random.normal(kw1, (hidden_size, input_dim), jnp.float32) * 0.1
    b1 = jax.random.normal(kb1, (hidden_size,), jnp.float32) * 0.1
    w2 = jax.random.normal(kw2, (output_dim, hidden_size), jnp.float32) * 0.1
    b2 = jax.random.normal(kb2, (output_dim,), jnp.float32) * 0.1

    # Exercise both the single-tile path (batch=8) and the row-padding path.
    for batch in (8, 2500):
        xk = jax.random.fold_in(kx, batch)
        x = jax.random.normal(xk, (batch, input_dim), jnp.float32)

        y = net_forward(x, w1, b1, w2, b2, force_pallas=True)
        jax.block_until_ready(y)

        ref = jnp.dot(jax.nn.sigmoid(jnp.dot(x, w1.T) + b1), w2.T) + b2
        assert y.shape == (batch, output_dim)
        assert jnp.allclose(y, ref, atol=1e-5, rtol=1e-5)

    print("KERNEL_OK")
</pallas_src>

<mosaic_0001>
module attributes {stable_mosaic.version = 11 : i64} {
  func.func @mlp_kernel(%arg0: i32, %arg1: memref<6x1x128xf32, #tpu.memory_space<vmem>>, %arg2: memref<36xf32, #tpu.memory_space<smem>>, %arg3: memref<6xf32, #tpu.memory_space<smem>>, %arg4: memref<6xf32, #tpu.memory_space<smem>>, %arg5: memref<1xf32, #tpu.memory_space<smem>>, %arg6: memref<1x1x128xf32, #tpu.memory_space<vmem>>) attributes {dimension_semantics = [#tpu.dimension_semantics<parallel>], iteration_bounds = array<i64: 1>, scalar_prefetch = 0 : i64, scratch_operands = 0 : i64, tpu.core_type = #tpu.core_type<tc>, window_params = [{transform_indices = @transform_0, window_bounds = array<i64: 6, 1, 128>}, {transform_indices = @transform_1, window_bounds = array<i64: 36>}, {transform_indices = @transform_2, window_bounds = array<i64: 6>}, {transform_indices = @transform_3, window_bounds = array<i64: 6>}, {transform_indices = @transform_4, window_bounds = array<i64: 1>}, {transform_indices = @transform_5, window_bounds = array<i64: 1, 1, 128>}]} {
    %c0 = arith.constant 0 : index
    %c0_0 = arith.constant 0 : index
    %c0_1 = arith.constant 0 : index
    %0 = vector.load %arg1[%c0, %c0_0, %c0_1] : memref<6x1x128xf32, #tpu.memory_space<vmem>>, vector<6x1x128xf32>
    %1 = vector.extract_strided_slice %0 {offsets = [0, 0, 0], sizes = [1, 1, 128], strides = [1, 1, 1]} : vector<6x1x128xf32> to vector<1x1x128xf32>
    %2 = vector.shape_cast %1 : vector<1x1x128xf32> to vector<1x128xf32>
    %c0_2 = arith.constant 0 : index
    %3 = memref.load %arg2[%c0_2] : memref<36xf32, #tpu.memory_space<smem>>
    %4 = vector.broadcast %3 : f32 to vector<1x128xf32>
    %5 = arith.mulf %2, %4 : vector<1x128xf32>
    %c0_3 = arith.constant 0 : index
    %6 = memref.load %arg3[%c0_3] : memref<6xf32, #tpu.memory_space<smem>>
    %7 = vector.broadcast %6 : f32 to vector<1x128xf32>
    %8 = arith.addf %5, %7 : vector<1x128xf32>
    %9 = vector.extract_strided_slice %0 {offsets = [1, 0, 0], sizes = [1, 1, 128], strides = [1, 1, 1]} : vector<6x1x128xf32> to vector<1x1x128xf32>
    %10 = vector.shape_cast %9 : vector<1x1x128xf32> to vector<1x128xf32>
    %c1 = arith.constant 1 : index
    %11 = memref.load %arg2[%c1] : memref<36xf32, #tpu.memory_space<smem>>
    %12 = vector.broadcast %11 : f32 to vector<1x128xf32>
    %13 = arith.mulf %10, %12 : vector<1x128xf32>
    %14 = arith.addf %8, %13 : vector<1x128xf32>
    %15 = vector.extract_strided_slice %0 {offsets = [2, 0, 0], sizes = [1, 1, 128], strides = [1, 1, 1]} : vector<6x1x128xf32> to vector<1x1x128xf32>
    %16 = vector.shape_cast %15 : vector<1x1x128xf32> to vector<1x128xf32>
    %c2 = arith.constant 2 : index
    %17 = memref.load %arg2[%c2] : memref<36xf32, #tpu.memory_space<smem>>
    %18 = vector.broadcast %17 : f32 to vector<1x128xf32>
    %19 = arith.mulf %16, %18 : vector<1x128xf32>
    %20 = arith.addf %14, %19 : vector<1x128xf32>
    %21 = vector.extract_strided_slice %0 {offsets = [3, 0, 0], sizes = [1, 1, 128], strides = [1, 1, 1]} : vector<6x1x128xf32> to vector<1x1x128xf32>
    %22 = vector.shape_cast %21 : vector<1x1x128xf32> to vector<1x128xf32>
    %c3 = arith.constant 3 : index
    %23 = memref.load %arg2[%c3] : memref<36xf32, #tpu.memory_space<smem>>
    %24 = vector.broadcast %23 : f32 to vector<1x128xf32>
    %25 = arith.mulf %22, %24 : vector<1x128xf32>
    %26 = arith.addf %20, %25 : vector<1x128xf32>
    %27 = vector.extract_strided_slice %0 {offsets = [4, 0, 0], sizes = [1, 1, 128], strides = [1, 1, 1]} : vector<6x1x128xf32> to vector<1x1x128xf32>
    %28 = vector.shape_cast %27 : vector<1x1x128xf32> to vector<1x128xf32>
    %c4 = arith.constant 4 : index
    %29 = memref.load %arg2[%c4] : memref<36xf32, #tpu.memory_space<smem>>
    %30 = vector.broadcast %29 : f32 to vector<1x128xf32>
    %31 = arith.mulf %28, %30 : vector<1x128xf32>
    %32 = arith.addf %26, %31 : vector<1x128xf32>
    %33 = vector.extract_strided_slice %0 {offsets = [5, 0, 0], sizes = [1, 1, 128], strides = [1, 1, 1]} : vector<6x1x128xf32> to vector<1x1x128xf32>
    %34 = vector.shape_cast %33 : vector<1x1x128xf32> to vector<1x128xf32>
    %c5 = arith.constant 5 : index
    %35 = memref.load %arg2[%c5] : memref<36xf32, #tpu.memory_space<smem>>
    %36 = vector.broadcast %35 : f32 to vector<1x128xf32>
    %37 = arith.mulf %34, %36 : vector<1x128xf32>
    %38 = arith.addf %32, %37 : vector<1x128xf32>
    %39 = arith.negf %38 : vector<1x128xf32>
    %40 = math.exp %39 : vector<1x128xf32>
    %cst = arith.constant 1.000000e+00 : f32
    %41 = vector.broadcast %cst : f32 to vector<1x128xf32>
    %42 = arith.addf %41, %40 : vector<1x128xf32>
    %43 = arith.divf %41, %42 : vector<1x128xf32>
    %44 = vector.extract_strided_slice %0 {offsets = [0, 0, 0], sizes = [1, 1, 128], strides = [1, 1, 1]} : vector<6x1x128xf32> to vector<1x1x128xf32>
    %45 = vector.shape_cast %44 : vector<1x1x128xf32> to vector<1x128xf32>
    %c6 = arith.constant 6 : index
    %46 = memref.load %arg2[%c6] : memref<36xf32, #tpu.memory_space<smem>>
    %47 = vector.broadcast %46 : f32 to vector<1x128xf32>
    %48 = arith.mulf %45, %47 : vector<1x128xf32>
    %c1_4 = arith.constant 1 : index
    %49 = memref.load %arg3[%c1_4] : memref<6xf32, #tpu.memory_space<smem>>
    %50 = vector.broadcast %49 : f32 to vector<1x128xf32>
    %51 = arith.addf %48, %50 : vector<1x128xf32>
    %52 = vector.extract_strided_slice %0 {offsets = [1, 0, 0], sizes = [1, 1, 128], strides = [1, 1, 1]} : vector<6x1x128xf32> to vector<1x1x128xf32>
    %53 = vector.shape_cast %52 : vector<1x1x128xf32> to vector<1x128xf32>
    %c7 = arith.constant 7 : index
    %54 = memref.load %arg2[%c7] : memref<36xf32, #tpu.memory_space<smem>>
    %55 = vector.broadcast %54 : f32 to vector<1x128xf32>
    %56 = arith.mulf %53, %55 : vector<1x128xf32>
    %57 = arith.addf %51, %56 : vector<1x128xf32>
    %58 = vector.extract_strided_slice %0 {offsets = [2, 0, 0], sizes = [1, 1, 128], strides = [1, 1, 1]} : vector<6x1x128xf32> to vector<1x1x128xf32>
    %59 = vector.shape_cast %58 : vector<1x1x128xf32> to vector<1x128xf32>
    %c8 = arith.constant 8 : index
    %60 = memref.load %arg2[%c8] : memref<36xf32, #tpu.memory_space<smem>>
    %61 = vector.broadcast %60 : f32 to vector<1x128xf32>
    %62 = arith.mulf %59, %61 : vector<1x128xf32>
    %63 = arith.addf %57, %62 : vector<1x128xf32>
    %64 = vector.extract_strided_slice %0 {offsets = [3, 0, 0], sizes = [1, 1, 128], strides = [1, 1, 1]} : vector<6x1x128xf32> to vector<1x1x128xf32>
    %65 = vector.shape_cast %64 : vector<1x1x128xf32> to vector<1x128xf32>
    %c9 = arith.constant 9 : index
    %66 = memref.load %arg2[%c9] : memref<36xf32, #tpu.memory_space<smem>>
    %67 = vector.broadcast %66 : f32 to vector<1x128xf32>
    %68 = arith.mulf %65, %67 : vector<1x128xf32>
    %69 = arith.addf %63, %68 : vector<1x128xf32>
    %70 = vector.extract_strided_slice %0 {offsets = [4, 0, 0], sizes = [1, 1, 128], strides = [1, 1, 1]} : vector<6x1x128xf32> to vector<1x1x128xf32>
    %71 = vector.shape_cast %70 : vector<1x1x128xf32> to vector<1x128xf32>
    %c10 = arith.constant 10 : index
    %72 = memref.load %arg2[%c10] : memref<36xf32, #tpu.memory_space<smem>>
    %73 = vector.broadcast %72 : f32 to vector<1x128xf32>
    %74 = arith.mulf %71, %73 : vector<1x128xf32>
    %75 = arith.addf %69, %74 : vector<1x128xf32>
    %76 = vector.extract_strided_slice %0 {offsets = [5, 0, 0], sizes = [1, 1, 128], strides = [1, 1, 1]} : vector<6x1x128xf32> to vector<1x1x128xf32>
    %77 = vector.shape_cast %76 : vector<1x1x128xf32> to vector<1x128xf32>
    %c11 = arith.constant 11 : index
    %78 = memref.load %arg2[%c11] : memref<36xf32, #tpu.memory_space<smem>>
    %79 = vector.broadcast %78 : f32 to vector<1x128xf32>
    %80 = arith.mulf %77, %79 : vector<1x128xf32>
    %81 = arith.addf %75, %80 : vector<1x128xf32>
    %82 = arith.negf %81 : vector<1x128xf32>
    %83 = math.exp %82 : vector<1x128xf32>
    %cst_5 = arith.constant 1.000000e+00 : f32
    %84 = vector.broadcast %cst_5 : f32 to vector<1x128xf32>
    %85 = arith.addf %84, %83 : vector<1x128xf32>
    %86 = arith.divf %84, %85 : vector<1x128xf32>
    %87 = vector.extract_strided_slice %0 {offsets = [0, 0, 0], sizes = [1, 1, 128], strides = [1, 1, 1]} : vector<6x1x128xf32> to vector<1x1x128xf32>
    %88 = vector.shape_cast %87 : vector<1x1x128xf32> to vector<1x128xf32>
    %c12 = arith.constant 12 : index
    %89 = memref.load %arg2[%c12] : memref<36xf32, #tpu.memory_space<smem>>
    %90 = vector.broadcast %89 : f32 to vector<1x128xf32>
    %91 = arith.mulf %88, %90 : vector<1x128xf32>
    %c2_6 = arith.constant 2 : index
    %92 = memref.load %arg3[%c2_6] : memref<6xf32, #tpu.memory_space<smem>>
    %93 = vector.broadcast %92 : f32 to vector<1x128xf32>
    %94 = arith.addf %91, %93 : vector<1x128xf32>
    %95 = vector.extract_strided_slice %0 {offsets = [1, 0, 0], sizes = [1, 1, 128], strides = [1, 1, 1]} : vector<6x1x128xf32> to vector<1x1x128xf32>
    %96 = vector.shape_cast %95 : vector<1x1x128xf32> to vector<1x128xf32>
    %c13 = arith.constant 13 : index
    %97 = memref.load %arg2[%c13] : memref<36xf32, #tpu.memory_space<smem>>
    %98 = vector.broadcast %97 : f32 to vector<1x128xf32>
    %99 = arith.mulf %96, %98 : vector<1x128xf32>
    %100 = arith.addf %94, %99 : vector<1x128xf32>
    %101 = vector.extract_strided_slice %0 {offsets = [2, 0, 0], sizes = [1, 1, 128], strides = [1, 1, 1]} : vector<6x1x128xf32> to vector<1x1x128xf32>
    %102 = vector.shape_cast %101 : vector<1x1x128xf32> to vector<1x128xf32>
    %c14 = arith.constant 14 : index
    %103 = memref.load %arg2[%c14] : memref<36xf32, #tpu.memory_space<smem>>
    %104 = vector.broadcast %103 : f32 to vector<1x128xf32>
    %105 = arith.mulf %102, %104 : vector<1x128xf32>
    %106 = arith.addf %100, %105 : vector<1x128xf32>
    %107 = vector.extract_strided_slice %0 {offsets = [3, 0, 0], sizes = [1, 1, 128], strides = [1, 1, 1]} : vector<6x1x128xf32> to vector<1x1x128xf32>
    %108 = vector.shape_cast %107 : vector<1x1x128xf32> to vector<1x128xf32>
    %c15 = arith.constant 15 : index
    %109 = memref.load %arg2[%c15] : memref<36xf32, #tpu.memory_space<smem>>
    %110 = vector.broadcast %109 : f32 to vector<1x128xf32>
    %111 = arith.mulf %108, %110 : vector<1x128xf32>
    %112 = arith.addf %106, %111 : vector<1x128xf32>
    %113 = vector.extract_strided_slice %0 {offsets = [4, 0, 0], sizes = [1, 1, 128], strides = [1, 1, 1]} : vector<6x1x128xf32> to vector<1x1x128xf32>
    %114 = vector.shape_cast %113 : vector<1x1x128xf32> to vector<1x128xf32>
    %c16 = arith.constant 16 : index
    %115 = memref.load %arg2[%c16] : memref<36xf32, #tpu.memory_space<smem>>
    %116 = vector.broadcast %115 : f32 to vector<1x128xf32>
    %117 = arith.mulf %114, %116 : vector<1x128xf32>
    %118 = arith.addf %112, %117 : vector<1x128xf32>
    %119 = vector.extract_strided_slice %0 {offsets = [5, 0, 0], sizes = [1, 1, 128], strides = [1, 1, 1]} : vector<6x1x128xf32> to vector<1x1x128xf32>
    %120 = vector.shape_cast %119 : vector<1x1x128xf32> to vector<1x128xf32>
    %c17 = arith.constant 17 : index
    %121 = memref.load %arg2[%c17] : memref<36xf32, #tpu.memory_space<smem>>
    %122 = vector.broadcast %121 : f32 to vector<1x128xf32>
    %123 = arith.mulf %120, %122 : vector<1x128xf32>
    %124 = arith.addf %118, %123 : vector<1x128xf32>
    %125 = arith.negf %124 : vector<1x128xf32>
    %126 = math.exp %125 : vector<1x128xf32>
    %cst_7 = arith.constant 1.000000e+00 : f32
    %127 = vector.broadcast %cst_7 : f32 to vector<1x128xf32>
    %128 = arith.addf %127, %126 : vector<1x128xf32>
    %129 = arith.divf %127, %128 : vector<1x128xf32>
    %130 = vector.extract_strided_slice %0 {offsets = [0, 0, 0], sizes = [1, 1, 128], strides = [1, 1, 1]} : vector<6x1x128xf32> to vector<1x1x128xf32>
    %131 = vector.shape_cast %130 : vector<1x1x128xf32> to vector<1x128xf32>
    %c18 = arith.constant 18 : index
    %132 = memref.load %arg2[%c18] : memref<36xf32, #tpu.memory_space<smem>>
    %133 = vector.broadcast %132 : f32 to vector<1x128xf32>
    %134 = arith.mulf %131, %133 : vector<1x128xf32>
    %c3_8 = arith.constant 3 : index
    %135 = memref.load %arg3[%c3_8] : memref<6xf32, #tpu.memory_space<smem>>
    %136 = vector.broadcast %135 : f32 to vector<1x128xf32>
    %137 = arith.addf %134, %136 : vector<1x128xf32>
    %138 = vector.extract_strided_slice %0 {offsets = [1, 0, 0], sizes = [1, 1, 128], strides = [1, 1, 1]} : vector<6x1x128xf32> to vector<1x1x128xf32>
    %139 = vector.shape_cast %138 : vector<1x1x128xf32> to vector<1x128xf32>
    %c19 = arith.constant 19 : index
    %140 = memref.load %arg2[%c19] : memref<36xf32, #tpu.memory_space<smem>>
    %141 = vector.broadcast %140 : f32 to vector<1x128xf32>
    %142 = arith.mulf %139, %141 : vector<1x128xf32>
    %143 = arith.addf %137, %142 : vector<1x128xf32>
    %144 = vector.extract_strided_slice %0 {offsets = [2, 0, 0], sizes = [1, 1, 128], strides = [1, 1, 1]} : vector<6x1x128xf32> to vector<1x1x128xf32>
    %145 = vector.shape_cast %144 : vector<1x1x128xf32> to vector<1x128xf32>
    %c20 = arith.constant 20 : index
    %146 = memref.load %arg2[%c20] : memref<36xf32, #tpu.memory_space<smem>>
    %147 = vector.broadcast %146 : f32 to vector<1x128xf32>
    %148 = arith.mulf %145, %147 : vector<1x128xf32>
    %149 = arith.addf %143, %148 : vector<1x128xf32>
    %150 = vector.extract_strided_slice %0 {offsets = [3, 0, 0], sizes = [1, 1, 128], strides = [1, 1, 1]} : vector<6x1x128xf32> to vector<1x1x128xf32>
    %151 = vector.shape_cast %150 : vector<1x1x128xf32> to vector<1x128xf32>
    %c21 = arith.constant 21 : index
    %152 = memref.load %arg2[%c21] : memref<36xf32, #tpu.memory_space<smem>>
    %153 = vector.broadcast %152 : f32 to vector<1x128xf32>
    %154 = arith.mulf %151, %153 : vector<1x128xf32>
    %155 = arith.addf %149, %154 : vector<1x128xf32>
    %156 = vector.extract_strided_slice %0 {offsets = [4, 0, 0], sizes = [1, 1, 128], strides = [1, 1, 1]} : vector<6x1x128xf32> to vector<1x1x128xf32>
    %157 = vector.shape_cast %156 : vector<1x1x128xf32> to vector<1x128xf32>
    %c22 = arith.constant 22 : index
    %158 = memref.load %arg2[%c22] : memref<36xf32, #tpu.memory_space<smem>>
    %159 = vector.broadcast %158 : f32 to vector<1x128xf32>
    %160 = arith.mulf %157, %159 : vector<1x128xf32>
    %161 = arith.addf %155, %160 : vector<1x128xf32>
    %162 = vector.extract_strided_slice %0 {offsets = [5, 0, 0], sizes = [1, 1, 128], strides = [1, 1, 1]} : vector<6x1x128xf32> to vector<1x1x128xf32>
    %163 = vector.shape_cast %162 : vector<1x1x128xf32> to vector<1x128xf32>
    %c23 = arith.constant 23 : index
    %164 = memref.load %arg2[%c23] : memref<36xf32, #tpu.memory_space<smem>>
    %165 = vector.broadcast %164 : f32 to vector<1x128xf32>
    %166 = arith.mulf %163, %165 : vector<1x128xf32>
    %167 = arith.addf %161, %166 : vector<1x128xf32>
    %168 = arith.negf %167 : vector<1x128xf32>
    %169 = math.exp %168 : vector<1x128xf32>
    %cst_9 = arith.constant 1.000000e+00 : f32
    %170 = vector.broadcast %cst_9 : f32 to vector<1x128xf32>
    %171 = arith.addf %170, %169 : vector<1x128xf32>
    %172 = arith.divf %170, %171 : vector<1x128xf32>
    %173 = vector.extract_strided_slice %0 {offsets = [0, 0, 0], sizes = [1, 1, 128], strides = [1, 1, 1]} : vector<6x1x128xf32> to vector<1x1x128xf32>
    %174 = vector.shape_cast %173 : vector<1x1x128xf32> to vector<1x128xf32>
    %c24 = arith.constant 24 : index
    %175 = memref.load %arg2[%c24] : memref<36xf32, #tpu.memory_space<smem>>
    %176 = vector.broadcast %175 : f32 to vector<1x128xf32>
    %177 = arith.mulf %174, %176 : vector<1x128xf32>
    %c4_10 = arith.constant 4 : index
    %178 = memref.load %arg3[%c4_10] : memref<6xf32, #tpu.memory_space<smem>>
    %179 = vector.broadcast %178 : f32 to vector<1x128xf32>
    %180 = arith.addf %177, %179 : vector<1x128xf32>
    %181 = vector.extract_strided_slice %0 {offsets = [1, 0, 0], sizes = [1, 1, 128], strides = [1, 1, 1]} : vector<6x1x128xf32> to vector<1x1x128xf32>
    %182 = vector.shape_cast %181 : vector<1x1x128xf32> to vector<1x128xf32>
    %c25 = arith.constant 25 : index
    %183 = memref.load %arg2[%c25] : memref<36xf32, #tpu.memory_space<smem>>
    %184 = vector.broadcast %183 : f32 to vector<1x128xf32>
    %185 = arith.mulf %182, %184 : vector<1x128xf32>
    %186 = arith.addf %180, %185 : vector<1x128xf32>
    %187 = vector.extract_strided_slice %0 {offsets = [2, 0, 0], sizes = [1, 1, 128], strides = [1, 1, 1]} : vector<6x1x128xf32> to vector<1x1x128xf32>
    %188 = vector.shape_cast %187 : vector<1x1x128xf32> to vector<1x128xf32>
    %c26 = arith.constant 26 : index
    %189 = memref.load %arg2[%c26] : memref<36xf32, #tpu.memory_space<smem>>
    %190 = vector.broadcast %189 : f32 to vector<1x128xf32>
    %191 = arith.mulf %188, %190 : vector<1x128xf32>
    %192 = arith.addf %186, %191 : vector<1x128xf32>
    %193 = vector.extract_strided_slice %0 {offsets = [3, 0, 0], sizes = [1, 1, 128], strides = [1, 1, 1]} : vector<6x1x128xf32> to vector<1x1x128xf32>
    %194 = vector.shape_cast %193 : vector<1x1x128xf32> to vector<1x128xf32>
    %c27 = arith.constant 27 : index
    %195 = memref.load %arg2[%c27] : memref<36xf32, #tpu.memory_space<smem>>
    %196 = vector.broadcast %195 : f32 to vector<1x128xf32>
    %197 = arith.mulf %194, %196 : vector<1x128xf32>
    %198 = arith.addf %192, %197 : vector<1x128xf32>
    %199 = vector.extract_strided_slice %0 {offsets = [4, 0, 0], sizes = [1, 1, 128], strides = [1, 1, 1]} : vector<6x1x128xf32> to vector<1x1x128xf32>
    %200 = vector.shape_cast %199 : vector<1x1x128xf32> to vector<1x128xf32>
    %c28 = arith.constant 28 : index
    %201 = memref.load %arg2[%c28] : memref<36xf32, #tpu.memory_space<smem>>
    %202 = vector.broadcast %201 : f32 to vector<1x128xf32>
    %203 = arith.mulf %200, %202 : vector<1x128xf32>
    %204 = arith.addf %198, %203 : vector<1x128xf32>
    %205 = vector.extract_strided_slice %0 {offsets = [5, 0, 0], sizes = [1, 1, 128], strides = [1, 1, 1]} : vector<6x1x128xf32> to vector<1x1x128xf32>
    %206 = vector.shape_cast %205 : vector<1x1x128xf32> to vector<1x128xf32>
    %c29 = arith.constant 29 : index
    %207 = memref.load %arg2[%c29] : memref<36xf32, #tpu.memory_space<smem>>
    %208 = vector.broadcast %207 : f32 to vector<1x128xf32>
    %209 = arith.mulf %206, %208 : vector<1x128xf32>
    %210 = arith.addf %204, %209 : vector<1x128xf32>
    %211 = arith.negf %210 : vector<1x128xf32>
    %212 = math.exp %211 : vector<1x128xf32>
    %cst_11 = arith.constant 1.000000e+00 : f32
    %213 = vector.broadcast %cst_11 : f32 to vector<1x128xf32>
    %214 = arith.addf %213, %212 : vector<1x128xf32>
    %215 = arith.divf %213, %214 : vector<1x128xf32>
    %216 = vector.extract_strided_slice %0 {offsets = [0, 0, 0], sizes = [1, 1, 128], strides = [1, 1, 1]} : vector<6x1x128xf32> to vector<1x1x128xf32>
    %217 = vector.shape_cast %216 : vector<1x1x128xf32> to vector<1x128xf32>
    %c30 = arith.constant 30 : index
    %218 = memref.load %arg2[%c30] : memref<36xf32, #tpu.memory_space<smem>>
    %219 = vector.broadcast %218 : f32 to vector<1x128xf32>
    %220 = arith.mulf %217, %219 : vector<1x128xf32>
    %c5_12 = arith.constant 5 : index
    %221 = memref.load %arg3[%c5_12] : memref<6xf32, #tpu.memory_space<smem>>
    %222 = vector.broadcast %221 : f32 to vector<1x128xf32>
    %223 = arith.addf %220, %222 : vector<1x128xf32>
    %224 = vector.extract_strided_slice %0 {offsets = [1, 0, 0], sizes = [1, 1, 128], strides = [1, 1, 1]} : vector<6x1x128xf32> to vector<1x1x128xf32>
    %225 = vector.shape_cast %224 : vector<1x1x128xf32> to vector<1x128xf32>
    %c31 = arith.constant 31 : index
    %226 = memref.load %arg2[%c31] : memref<36xf32, #tpu.memory_space<smem>>
    %227 = vector.broadcast %226 : f32 to vector<1x128xf32>
    %228 = arith.mulf %225, %227 : vector<1x128xf32>
    %229 = arith.addf %223, %228 : vector<1x128xf32>
    %230 = vector.extract_strided_slice %0 {offsets = [2, 0, 0], sizes = [1, 1, 128], strides = [1, 1, 1]} : vector<6x1x128xf32> to vector<1x1x128xf32>
    %231 = vector.shape_cast %230 : vector<1x1x128xf32> to vector<1x128xf32>
    %c32 = arith.constant 32 : index
    %232 = memref.load %arg2[%c32] : memref<36xf32, #tpu.memory_space<smem>>
    %233 = vector.broadcast %232 : f32 to vector<1x128xf32>
    %234 = arith.mulf %231, %233 : vector<1x128xf32>
    %235 = arith.addf %229, %234 : vector<1x128xf32>
    %236 = vector.extract_strided_slice %0 {offsets = [3, 0, 0], sizes = [1, 1, 128], strides = [1, 1, 1]} : vector<6x1x128xf32> to vector<1x1x128xf32>
    %237 = vector.shape_cast %236 : vector<1x1x128xf32> to vector<1x128xf32>
    %c33 = arith.constant 33 : index
    %238 = memref.load %arg2[%c33] : memref<36xf32, #tpu.memory_space<smem>>
    %239 = vector.broadcast %238 : f32 to vector<1x128xf32>
    %240 = arith.mulf %237, %239 : vector<1x128xf32>
    %241 = arith.addf %235, %240 : vector<1x128xf32>
    %242 = vector.extract_strided_slice %0 {offsets = [4, 0, 0], sizes = [1, 1, 128], strides = [1, 1, 1]} : vector<6x1x128xf32> to vector<1x1x128xf32>
    %243 = vector.shape_cast %242 : vector<1x1x128xf32> to vector<1x128xf32>
    %c34 = arith.constant 34 : index
    %244 = memref.load %arg2[%c34] : memref<36xf32, #tpu.memory_space<smem>>
    %245 = vector.broadcast %244 : f32 to vector<1x128xf32>
    %246 = arith.mulf %243, %245 : vector<1x128xf32>
    %247 = arith.addf %241, %246 : vector<1x128xf32>
    %248 = vector.extract_strided_slice %0 {offsets = [5, 0, 0], sizes = [1, 1, 128], strides = [1, 1, 1]} : vector<6x1x128xf32> to vector<1x1x128xf32>
    %249 = vector.shape_cast %248 : vector<1x1x128xf32> to vector<1x128xf32>
    %c35 = arith.constant 35 : index
    %250 = memref.load %arg2[%c35] : memref<36xf32, #tpu.memory_space<smem>>
    %251 = vector.broadcast %250 : f32 to vector<1x128xf32>
    %252 = arith.mulf %249, %251 : vector<1x128xf32>
    %253 = arith.addf %247, %252 : vector<1x128xf32>
    %254 = arith.negf %253 : vector<1x128xf32>
    %255 = math.exp %254 : vector<1x128xf32>
    %cst_13 = arith.constant 1.000000e+00 : f32
    %256 = vector.broadcast %cst_13 : f32 to vector<1x128xf32>
    %257 = arith.addf %256, %255 : vector<1x128xf32>
    %258 = arith.divf %256, %257 : vector<1x128xf32>
    %c0_14 = arith.constant 0 : index
    %259 = memref.load %arg4[%c0_14] : memref<6xf32, #tpu.memory_space<smem>>
    %260 = vector.broadcast %259 : f32 to vector<1x128xf32>
    %261 = arith.mulf %43, %260 : vector<1x128xf32>
    %c0_15 = arith.constant 0 : index
    %262 = memref.load %arg5[%c0_15] : memref<1xf32, #tpu.memory_space<smem>>
    %263 = vector.broadcast %262 : f32 to vector<1x128xf32>
    %264 = arith.addf %261, %263 : vector<1x128xf32>
    %c1_16 = arith.constant 1 : index
    %265 = memref.load %arg4[%c1_16] : memref<6xf32, #tpu.memory_space<smem>>
    %266 = vector.broadcast %265 : f32 to vector<1x128xf32>
    %267 = arith.mulf %86, %266 : vector<1x128xf32>
    %268 = arith.addf %264, %267 : vector<1x128xf32>
    %c2_17 = arith.constant 2 : index
    %269 = memref.load %arg4[%c2_17] : memref<6xf32, #tpu.memory_space<smem>>
    %270 = vector.broadcast %269 : f32 to vector<1x128xf32>
    %271 = arith.mulf %129, %270 : vector<1x128xf32>
    %272 = arith.addf %268, %271 : vector<1x128xf32>
    %c3_18 = arith.constant 3 : index
    %273 = memref.load %arg4[%c3_18] : memref<6xf32, #tpu.memory_space<smem>>
    %274 = vector.broadcast %273 : f32 to vector<1x128xf32>
    %275 = arith.mulf %172, %274 : vector<1x128xf32>
    %276 = arith.addf %272, %275 : vector<1x128xf32>
    %c4_19 = arith.constant 4 : index
    %277 = memref.load %arg4[%c4_19] : memref<6xf32, #tpu.memory_space<smem>>
    %278 = vector.broadcast %277 : f32 to vector<1x128xf32>
    %279 = arith.mulf %215, %278 : vector<1x128xf32>
    %280 = arith.addf %276, %279 : vector<1x128xf32>
    %c5_20 = arith.constant 5 : index
    %281 = memref.load %arg4[%c5_20] : memref<6xf32, #tpu.memory_space<smem>>
    %282 = vector.broadcast %281 : f32 to vector<1x128xf32>
    %283 = arith.mulf %258, %282 : vector<1x128xf32>
    %284 = arith.addf %280, %283 : vector<1x128xf32>
    %c0_21 = arith.constant 0 : index
    %c0_22 = arith.constant 0 : index
    %c0_23 = arith.constant 0 : index
    %285 = vector.load %arg6[%c0_21, %c0_22, %c0_23] : memref<1x1x128xf32, #tpu.memory_space<vmem>>, vector<1x1x128xf32>
    %286 = vector.shape_cast %285 : vector<1x1x128xf32> to vector<1x128xf32>
    %287 = vector.shape_cast %284 : vector<1x128xf32> to vector<1x1x128xf32>
    tpu.vector_store %arg6[%c0_21, %c0_22, %c0_23], %287 {strides = array<i32>} : memref<1x1x128xf32, #tpu.memory_space<vmem>>, vector<1x1x128xf32>,
    return
  }
  func.func @transform_0(%arg0: i32) -> (i32, i32, i32) {
    %c0_i32 = arith.constant 0 : i32
    %c0_i32_0 = arith.constant 0 : i32
    %c0_i32_1 = arith.constant 0 : i32
    return %c0_i32, %arg0, %c0_i32_0 : i32, i32, i32
  }
  func.func @transform_1(%arg0: i32) -> i32 {
    %c0_i32 = arith.constant 0 : i32
    %c0_i32_0 = arith.constant 0 : i32
    return %c0_i32 : i32
  }
  func.func @transform_2(%arg0: i32) -> i32 {
    %c0_i32 = arith.constant 0 : i32
    %c0_i32_0 = arith.constant 0 : i32
    return %c0_i32 : i32
  }
  func.func @transform_3(%arg0: i32) -> i32 {
    %c0_i32 = arith.constant 0 : i32
    %c0_i32_0 = arith.constant 0 : i32
    return %c0_i32 : i32
  }
  func.func @transform_4(%arg0: i32) -> i32 {
    %c0_i32 = arith.constant 0 : i32
    %c0_i32_0 = arith.constant 0 : i32
    return %c0_i32 : i32
  }
  func.func @transform_5(%arg0: i32) -> (i32, i32, i32) {
    %c0_i32 = arith.constant 0 : i32
    %c0_i32_0 = arith.constant 0 : i32
    %c0_i32_1 = arith.constant 0 : i32
    return %c0_i32, %arg0, %c0_i32_0 : i32, i32, i32
  }
}

</mosaic_0001>

<bundles_post_ra>
// kernel: tpu_custom_call.1
= control target key start
LH: loop header
LB: loop body
LE: loop exit
PB: predicated region body
PF: predicated region fallthrough
CT: control target
= control target key end

     0   :  { %11 = vsyncpa [#allocation4], 0  ;;  %s835_s0 = inlined_call_operand.hbm [shape: f32[6,1,128], index: 0, kind: input, shape index: {}]   ;;  %s836_s1 = inlined_call_operand.vmem [shape: f32[36], index: 1, kind: input, shape index: {}]   ;;  %s837_s2 = inlined_call_operand.vmem [shape: f32[6], index: 2, kind: input, shape index: {}]   ;;  %s838_s3 = inlined_call_operand.vmem [shape: f32[6], index: 3, kind: input, shape index: {}]   ;;  %s839_s4 = inlined_call_operand.<no memory space> [shape: f32[1], index: 4, kind: input, shape index: {}]   ;;  %s840_s5 = inlined_call_operand.hbm [shape: f32[1,1,128], index: 5, kind: output, shape index: {}]  }
   0x1   :  { %12 = vsyncpa [#allocation6], 0 }
   0x2   :  { %13 = vsyncpa [#allocation9], 0  ;;  %s42_s20 = sshll.u32 %s837_s2, 4  ;;  %s43_s20 = int_to_ptr.vmem [resolvable:$true] %s42_s20 }
   0x3   :  { %14 = vsyncpa [#allocation5], 0  ;;  %s19_s23 = sshll.u32 %s835_s0, 4  ;;  %s570_s24 = smov [#allocation8]   ;;  %s20_s23 = int_to_ptr.hbm [resolvable:$true] %s19_s23 }
   0x4   :  { %45 = dma.vmem_to_smem %s43_s20, 16, %s570_s24, [#allocation9]  }
   0x5   :  { %s571_s25 = smov [#allocation3]   ;;  %s572_s27 = smov 16  }
   0x6   :  { %s21_s26 = sshll.u32 %s571_s25, 4  ;;  %s573_s28 = smov 1   ;;  %s22_s26 = int_to_ptr.vmem [resolvable:$true] %s21_s26 }
   0x7   :  { %27 = dma.hbm_to_vmem [thread:$0]  %s20_s23, 96, %s22_s26, [#allocation4], %s572_s27, %s572_s27, %s573_s28  }
   0x8   :  { %s33_s6 = sshll.u32 %s836_s1, 4  ;;  %s51_s8 = sshll.u32 %s838_s3, 4  ;;  %s34_s6 = int_to_ptr.vmem [resolvable:$true] %s33_s6  ;;  %s52_s8 = int_to_ptr.vmem [resolvable:$true] %s51_s8 }
   0x9   :  { %s574_s9 = smov [#allocation7]   ;;  %s575_s0 = smov [#allocation10]  }
   0xa   :  { %36 = dma.vmem_to_smem %s34_s6, 16, %s574_s9, [#allocation6]  }
   0xb   :  { %54 = dma.vmem_to_smem %s52_s8, 16, %s575_s0, [#allocation9]  }
   0xc   :  { %562 = dma.done.wait [#allocation4], 96  }
   0xd   :  { %563 = vsyncadd [#allocation4], 4294967200 }
   0xe   :  { %564 = dma.done.wait [#allocation6], 16  }
   0xf   :  { %565 = vsyncadd [#allocation6], 4294967280 }
  0x10   :  { %566 = dma.done.wait [#allocation9], 32  }
  0x11   :  { %567 = vsyncadd [#allocation9], 4294967264 }
  0x12   :  { %73 = sfence }
  0x13   :  { %s80_s10 = sld [smem:[#allocation7]]  ;;  %v619_v0 = vld [vmem:[#allocation3] sm:$0x1]  ;;  %v621_v1 = vld [vmem:[#allocation3 + $0x1] sm:$0x1] }
  0x14   :  { %s83_s11 = sld [smem:[#allocation8]]  ;;  %v625_v3 = vld [vmem:[#allocation3 + $0x2] sm:$0x1]  ;;  %v628_v6 = vld [vmem:[#allocation3 + $0x3] sm:$0x1] }
  0x15   :  { %s396_s1 = sld [smem:[#allocation7 + $0x1]]  ;;  %v631_v11 = vld [vmem:[#allocation3 + $0x4] sm:$0x1]  ;;  %v635_v17 = vld [vmem:[#allocation3 + $0x5] sm:$0x1] }
  0x16   :  { %s397_s12 = sld [smem:[#allocation7 + $0x2]] }
  0x17   :  { %s398_s13 = sld [smem:[#allocation7 + $0x3]] }
  0x18   :  { %s399_s3 = sld [smem:[#allocation7 + $0x4]] }
  0x19   :  { %v81_v2 = vstv %s80_s10  ;;  %s623_s14 = sld [smem:[#allocation7 + $0x5]] }
  0x1a   :  { %v82_v4 = vmul.f32 %v81_v2, %v619_v0  ;;  %v84_v5 = vstv %s83_s11  ;;  %s402_s15 = sld [smem:[#allocation7 + $0x6]] }
  0x1b   :  { %v87_v7 = vstv %s396_s1  ;;  %s403_s16 = sld [smem:[#allocation8 + $0x1]] }
  0x1c   :  { %v85_v8 = vadd.f32 %v84_v5, %v82_v4  ;;  %v88_v9 = vmul.f32 %v87_v7, %v621_v1  ;;  %v91_v10 = vstv %s397_s12  ;;  %s404_s17 = sld [smem:[#allocation7 + $0x7]] }
  0x1d   :  { %v92_v12 = vmul.f32 %v91_v10, %v625_v3  ;;  %v95_v13 = vstv %s398_s13  ;;  %s405_s18 = sld [smem:[#allocation7 + $0x8]] }
  0x1e   :  { %v89_v14 = vadd.f32 %v88_v9, %v85_v8  ;;  %v96_v15 = vmul.f32 %v95_v13, %v628_v6  ;;  %v99_v16 = vstv %s399_s3  ;;  %s406_s19 = sld [smem:[#allocation7 + $0x9]] }
  0x1f   :  { %v103_v18 = vstv %s623_s14  ;;  %s407_s20 = sld [smem:[#allocation7 + $0xa]]  ;;  %v100_v20 = vmul.f32 %v99_v16, %v631_v11 }
  0x20   :  { %v93_v19 = vadd.f32 %v92_v12, %v89_v14  ;;  %v126_v21 = vstv %s402_s15  ;;  %s639_s21 = sld [smem:[#allocation7 + $0xb]]  ;;  %v104_v25 = vmul.f32 %v103_v18, %v635_v17 }
  0x21   :  { %v127_v22 = vmul.f32 %v126_v21, %v619_v0  ;;  %v129_v23 = vstv %s403_s16  ;;  %s410_s22 = sld [smem:[#allocation7 + $0xc]] }
  0x22   :  { %v97_v24 = vadd.f32 %v96_v15, %v93_v19  ;;  %v132_v26 = vstv %s404_s17  ;;  %s411_s23 = sld [smem:[#allocation8 + $0x2]] }
  0x23   :  { %v130_v27 = vadd.f32 %v129_v23, %v127_v22  ;;  %v133_v28 = vmul.f32 %v132_v26, %v621_v1  ;;  %v136_v29 = vstv %s405_s18  ;;  %s412_s24 = sld [smem:[#allocation7 + $0xd]] }
  0x24   :  { %v101_v30 = vadd.f32 %v100_v20, %v97_v24  ;;  %v137_v31 = vmul.f32 %v136_v29, %v625_v3  ;;  %v140_v32 = vstv %s406_s19  ;;  %s413_s25 = sld [smem:[#allocation7 + $0xe]] }
  0x25   :  { %v134_v33 = vadd.f32 %v133_v28, %v130_v27  ;;  %v141_v34 = vmul.f32 %v140_v32, %v628_v6  ;;  %v144_v35 = vstv %s407_s20  ;;  %s414_s26 = sld [smem:[#allocation7 + $0xf]] }
  0x26   :  { %v105_v36 = vadd.f32 %v104_v25, %v101_v30  ;;  %v148_v37 = vstv %s639_s21  ;;  %s415_s27 = sld [smem:[#allocation7 + $0x10]]  ;;  %v145_v39 = vmul.f32 %v144_v35, %v631_v11 }
  0x27   :  { %v138_v38 = vadd.f32 %v137_v31, %v134_v33  ;;  %v171_v40 = vstv %s410_s22  ;;  %s648_s28 = sld [smem:[#allocation7 + $0x11]]  ;;  %v149_v45 = vmul.f32 %v148_v37, %v635_v17 }
  0x28   :  { %v401_v41 = vmul.f32 -1.442695, %v105_v36  ;;  %v172_v42 = vmul.f32 %v171_v40, %v619_v0  ;;  %v174_v43 = vstv %s411_s23  ;;  %s418_s29 = sld [smem:[#allocation7 + $0x12]] }
  0x29   :  { %v142_v44 = vadd.f32 %v141_v34, %v138_v38  ;;  %v177_v46 = vstv %s412_s24  ;;  %s652_s30 = sld [smem:[#allocation8 + $0x3]] }
  0x2a   :  { %454 = vpow2.f32 %v401_v41  ;;  %v175_v47 = vadd.f32 %v174_v43, %v172_v42  ;;  %v178_v48 = vmul.f32 %v177_v46, %v621_v1  ;;  %v181_v49 = vstv %s413_s25  ;;  %s420_s6 = sld [smem:[#allocation7 + $0x13]] }
  0x2b   :  { %v146_v50 = vadd.f32 %v145_v39, %v142_v44  ;;  %v182_v51 = vmul.f32 %v181_v49, %v625_v3  ;;  %v185_v52 = vstv %s414_s26  ;;  %s656_s2 = sld [smem:[#allocation7 + $0x14]] }
  0x2c   :  { %v179_v53 = vadd.f32 %v178_v48, %v175_v47  ;;  %v186_v54 = vmul.f32 %v185_v52, %v628_v6  ;;  %v189_v55 = vstv %s415_s27  ;;  %s422_s7 = sld [smem:[#allocation7 + $0x15]] }
  0x2d   :  { %v150_v56 = vadd.f32 %v149_v45, %v146_v50  ;;  %v193_v57 = vstv %s648_s28  ;;  %s660_s8 = sld [smem:[#allocation7 + $0x16]]  ;;  %v190_v59 = vmul.f32 %v189_v55, %v631_v11  ;;  %s576_s28 = smov [#allocation11]  }
  0x2e   :  { %v183_v58 = vadd.f32 %v182_v51, %v179_v53  ;;  %v216_v60 = vstv %s418_s29  ;;  %s663_s9 = sld [smem:[#allocation7 + $0x17]]  ;;  %v194_v5 = vmul.f32 %v193_v57, %v635_v17  ;;  %s382_s29 = sshll.u32 %s576_s28, 4  ;;  %s383_s29 = int_to_ptr.vmem [resolvable:$true] %s382_s29 }
  0x2f   :  { %v409_v61 = vmul.f32 -1.442695, %v150_v56  ;;  %v217_v62 = vmul.f32 %v216_v60, %v619_v0  ;;  %v219_v63 = vstv %s652_s30  ;;  %s667_s0 = sld [smem:[#allocation7 + $0x18]] }
  0x30   :  { %v455_v2 = vpop.eup %454  ;;  %v187_v4 = vadd.f32 %v186_v54, %v183_v58  ;;  %v222_v7 = vstv %s420_s6  ;;  %s670_s10 = sld [smem:[#allocation8 + $0x4]] }
  0x31   :  { %v672_v8 = vadd.f32 1.0, %v455_v2  ;;  %456 = vpow2.f32 %v409_v61  ;;  %v220_v9 = vadd.f32 %v219_v63, %v217_v62  ;;  %v223_v10 = vmul.f32 %v222_v7, %v621_v1  ;;  %s428_s11 = sld [smem:[#allocation7 + $0x19]] }
  0x32   :  { %v191_v12 = vadd.f32 %v190_v59, %v187_v4  ;;  %v226_v13 = vstv %s656_s2  ;;  %v230_v14 = vstv %s422_s7  ;;  %s676_s1 = sld [smem:[#allocation7 + $0x1a]]  ;;  %s384_s2 = sshll.u32 %s840_s5, 4  ;;  %s385_s2 = int_to_ptr.hbm [resolvable:$true] %s384_s2 }
  0x33   :  { %458 = vrcp.f32 %v672_v8  ;;  %v224_v16 = vadd.f32 %v223_v10, %v220_v9  ;;  %v227_v18 = vmul.f32 %v226_v13, %v625_v3  ;;  %v231_v19 = vmul.f32 %v230_v14, %v628_v6  ;;  %s681_s12 = sld [smem:[#allocation7 + $0x1b]] }
  0x34   :  { %v195_v15 = vadd.f32 %v194_v5, %v191_v12  ;;  %v234_v20 = vstv %s660_s8  ;;  %s684_s13 = sld [smem:[#allocation7 + $0x1c]]  ;;  %v238_v23 = vstv %s663_s9  ;;  %vm115_vm0 = vweird.f32 %v672_v8 }
  0x35   :  { %v228_v22 = vadd.f32 %v227_v18, %v224_v16  ;;  %s687_s3 = sld [smem:[#allocation7 + $0x1e]]  ;;  %v235_v25 = vmul.f32 %v234_v20, %v631_v11  ;;  %v261_v26 = vstv %s667_s0  ;;  %v239_v33 = vmul.f32 %v238_v23, %v635_v17 }
  0x36   :  { %v417_v21 = vmul.f32 -1.442695, %v195_v15  ;;  %v264_v27 = vstv %s670_s10  ;;  %s692_s14 = sld [smem:[#allocation7 + $0x1d]]  ;;  %v262_v31 = vmul.f32 %v261_v26, %v619_v0  ;;  %v119_v18 = vand.u32 2147483647, %v672_v8 }
  0x37   :  { %v457_v24 = vpop.eup %456  ;;  %v267_v28 = vstv %s428_s11  ;;  %v232_v30 = vadd.f32 %v231_v19, %v228_v22  ;;  %s697_s15 = sld [smem:[#allocation8 + $0x5]] }
  0x38   :  { %v694_v29 = vadd.f32 1.0, %v457_v24  ;;  %460 = vpow2.f32 %v417_v21  ;;  %v268_v34 = vmul.f32 %v267_v28, %v621_v1  ;;  %v271_v35 = vstv %s676_s1  ;;  %s704_s16 = sld [smem:[#allocation7 + $0x1f]] }
  0x39   :  { %v699_v32 = vpop.eup %458  ;;  %v236_v36 = vadd.f32 %v235_v25, %v232_v30  ;;  %v265_v37 = vadd.f32 %v264_v27, %v262_v31  ;;  %v272_v38 = vmul.f32 %v271_v35, %v625_v3  ;;  %v275_v39 = vstv %s681_s12  ;;  %s709_s17 = sld [smem:[#allocation7 + $0x20]] }
  0x3a   :  { %462 = vrcp.f32 %v694_v29  ;;  %v111_v40 = vmul.f32 %v699_v32, %v672_v8  ;;  %s713_s18 = sld [smem:[#allocation7 + $0x21]]  ;;  %v279_v44 = vstv %s684_s13  ;;  %v276_v49 = vmul.f32 %v275_v39, %v628_v6 }
  0x3b   :  { %v240_v41 = vadd.f32 %v239_v33, %v236_v36  ;;  %v269_v42 = vadd.f32 %v268_v34, %v265_v37  ;;  %v306_v45 = vstv %s687_s3  ;;  %s717_s19 = sld [smem:[#allocation7 + $0x22]]  ;;  %v280_v55 = vmul.f32 %v279_v44, %v631_v11 }
  0x3c   :  { %s722_s20 = sld [smem:[#allocation7 + $0x23]]  ;;  %v283_v51 = vstv %s692_s14  ;;  %v307_v52 = vmul.f32 %v306_v45, %v619_v0  ;;  %v112_v54 = vsub.f32 1.0, %v111_v40  ;;  %vm116_vm1 = vweird.f32 %v699_v32 }
  0x3d   :  { %v425_v47 = vmul.f32 -1.442695, %v240_v41  ;;  %v273_v48 = vadd.f32 %v272_v38, %v269_v42  ;;  %v309_v53 = vstv %s697_s15  ;;  %v284_v59 = vmul.f32 %v283_v51, %v635_v17  ;;  %s757_s21 = sld [smem:[#allocation10]]  ;;  %vm761_vm2 = vmor %vm115_vm0, %vm116_vm1 }
  0x3e   :  { %v461_v43 = vpop.eup %460  ;;  %v312_v56 = vstv %s704_s16  ;;  %v310_v60 = vadd.f32 %v309_v53, %v307_v52  ;;  %v113_v62 = vmul.f32 %v699_v32, %v112_v54  ;;  %vm160_vm3 = vweird.f32 %v694_v29  ;;  %s774_s22 = sld [smem:[#allocation10 + $0x1]] }
  0x3f   :  { %v719_v46 = vadd.f32 1.0, %v461_v43  ;;  %v277_v58 = vadd.f32 %v276_v49, %v273_v48  ;;  %v313_v0 = vmul.f32 %v312_v56, %v621_v1  ;;  %v316_v61 = vstv %s709_s17  ;;  %s793_s23 = sld [smem:[#allocation10 + $0x2]] }
  0x40   :  { %v724_v50 = vpop.eup %462  ;;  %v317_v2 = vmul.f32 %v316_v61, %v625_v3  ;;  %v320_v4 = vstv %s713_s18  ;;  %v114_v21 = vadd.f32 %v699_v32, %v113_v62  ;;  %v164_v26 = vand.u32 2147483647, %v694_v29  ;;  %s812_s26 = sld [smem:[#allocation10 + $0x3]] }
  0x41   :  { %464 = vrcp.f32 %v719_v46  ;;  %v156_v57 = vmul.f32 %v724_v50, %v694_v29  ;;  %v281_v63 = vadd.f32 %v280_v55, %v277_v58  ;;  %v314_v7 = vadd.f32 %v313_v0, %v310_v60  ;;  %s446_s27 = sld [smem:[#allocation10 + $0x5]] }
  0x42   :  { %466 = vpow2.f32 %v425_v47  ;;  %v321_v9 = vmul.f32 %v320_v4, %v628_v6  ;;  %v324_v10 = vstv %s717_s19  ;;  %v328_v14 = vstv %s722_s20 }
  0x43   :  { %v157_v5 = vsub.f32 1.0, %v156_v57  ;;  %v285_v13 = vadd.f32 %v284_v59, %v281_v63  ;;  %v318_v16 = vadd.f32 %v317_v2, %v314_v7  ;;  %v325_v3 = vmul.f32 %v324_v10, %v631_v11 }
  0x44   :  { %v121_v6 = vand.u32 2147483648, %v672_v8  ;;  %v329_v24 = vmul.f32 %v328_v14, %v635_v17  ;;  %vm161_vm4 = vweird.f32 %v724_v50  ;;  %v166_v28 = vand.u32 2147483648, %v694_v29 }
  0x45   :  { %v433_v20 = vmul.f32 -1.442695, %v285_v13  ;;  %v158_v22 = vmul.f32 %v724_v50, %v157_v5  ;;  %v322_v23 = vadd.f32 %v321_v9, %v318_v16  ;;  %v118_v8 = vsel %vm761_vm2, %v699_v32, %v114_v21  ;;  %vm776_vm6 = vmor %vm160_vm3, %vm161_vm4 }
  0x46   :  { %v122_v17 = vor.u32 1.1754944e-38, %v121_v6  ;;  %vm120_vm5 = vcmp.eq.f32.partialorder %v119_v18, 8.507059e+37  ;;  %vm781_vm7 = vcmp.eq.f32.partialorder %v164_v26, 8.507059e+37  ;;  %v211_v29 = vand.u32 2147483648, %v719_v46 }
  0x47   :  { %v742_v12 = vpop.eup %464  ;;  %v326_v27 = vadd.f32 %v325_v3, %v322_v23  ;;  %v159_v30 = vadd.f32 %v724_v50, %v158_v22  ;;  %v167_v38 = vor.u32 1.1754944e-38, %v166_v28  ;;  %vm205_vm8 = vweird.f32 %v719_v46 }
  0x48   :  { %v467_v15 = vpop.eup %466  ;;  %v201_v1 = vmul.f32 %v742_v12, %v719_v46  ;;  %v123_v37 = vsel %vm120_vm5, %v122_v17, %v118_v8  ;;  %vm206_vm9 = vweird.f32 %v742_v12  ;;  %v351_v42 = vstv %s757_s21 }
  0x49   :  { %v752_v19 = vadd.f32 1.0, %v467_v15  ;;  %v330_v31 = vadd.f32 %v329_v24, %v326_v27  ;;  %v163_v40 = vsel %vm776_vm6, %v724_v50, %v159_v30  ;;  %v209_v44 = vand.u32 2147483647, %v719_v46  ;;  %vm797_vm10 = vmor %vm205_vm8, %vm206_vm9 }
  0x4a   :  { %v202_v25 = vsub.f32 1.0, %v201_v1  ;;  %v212_v48 = vor.u32 1.1754944e-38, %v211_v29  ;;  %v168_v50 = vsel %vm781_vm7, %v167_v38, %v163_v40  ;;  %v352_v51 = vmul.f32 %v351_v42, %v123_v37 }
  0x4b   :  { %468 = vrcp.f32 %v752_v19  ;;  %v441_v32 = vmul.f32 -1.442695, %v330_v31  ;;  %v354_v52 = vstv %s839_s4  ;;  %vm250_vm11 = vweird.f32 %v752_v19  ;;  %s820_s4 = sld [smem:[#allocation10 + $0x4]] }
  0x4c   :  { %470 = vpow2.f32 %v433_v20  ;;  %v203_v34 = vmul.f32 %v742_v12, %v202_v25  ;;  %v357_v46 = vstv %s774_s22  ;;  %vm210_vm13 = vcmp.eq.f32.partialorder %v209_v44, 8.507059e+37 }
  0x4d   :  { %472 = vpow2.f32 %v441_v32  ;;  %v256_v55 = vand.u32 2147483648, %v752_v19  ;;  %v254_v58 = vand.u32 2147483647, %v752_v19  ;;  %v355_v0 = vadd.f32 %v354_v52, %v352_v51 }
  0x4e   :  { %v204_v43 = vadd.f32 %v742_v12, %v203_v34  ;;  %v358_v61 = vmul.f32 %v357_v46, %v168_v50  ;;  %v361_v63 = vstv %s793_s23  ;;  %v365_v1 = vstv %s812_s26 }
  0x4f   :  { %v257_v4 = vor.u32 1.1754944e-38, %v256_v55  ;;  %vm255_vm15 = vcmp.eq.f32.partialorder %v254_v58, 8.507059e+37  ;;  %v373_v33 = vstv %s446_s27 }
  0x50   :  { %v208_v54 = vsel %vm797_vm10, %v742_v12, %v204_v43  ;;  %v359_v10 = vadd.f32 %v358_v61, %v355_v0 }
  0x51   :  { %v469_v36 = vpop.eup %468  ;;  %v213_v62 = vsel %vm210_vm13, %v212_v48, %v208_v54  ;;  %v369_v24 = vstv %s820_s4 }
  0x52   :  { %v471_v39 = vpop.eup %470  ;;  %v246_v41 = vmul.f32 %v469_v36, %v752_v19  ;;  %vm251_vm12 = vweird.f32 %v469_v36  ;;  %v362_v12 = vmul.f32 %v361_v63, %v213_v62 }
  0x53   :  { %v289_v45 = vadd.f32 1.0, %v471_v39  ;;  %v473_v56 = vpop.eup %472  ;;  %vm815_vm14 = vmor %vm250_vm11, %vm251_vm12 }
  0x54   :  { %v247_v49 = vsub.f32 1.0, %v246_v41  ;;  %v334_v60 = vadd.f32 1.0, %v473_v56  ;;  %v363_v19 = vadd.f32 %v362_v12, %v359_v10 }
  0x55   :  { %474 = vrcp.f32 %v289_v45  ;;  %v301_v9 = vand.u32 2147483648, %v289_v45  ;;  %vm295_vm0 = vweird.f32 %v289_v45  ;;  %v299_v14 = vand.u32 2147483647, %v289_v45 }
  0x56   :  { %v248_v53 = vmul.f32 %v469_v36, %v247_v49  ;;  %476 = vrcp.f32 %v334_v60  ;;  %vm340_vm4 = vweird.f32 %v334_v60  ;;  %v346_v23 = vand.u32 2147483648, %v334_v60 }
  0x57   :  { %v302_v6 = vor.u32 1.1754944e-38, %v301_v9  ;;  %vm300_vm3 = vcmp.eq.f32.partialorder %v299_v14, 8.507059e+37  ;;  %v344_v26 = vand.u32 2147483647, %v334_v60 }
  0x58   :  { %v249_v57 = vadd.f32 %v469_v36, %v248_v53  ;;  %v347_v30 = vor.u32 1.1754944e-38, %v346_v23 }
  0x59   :  { %vm345_vm7 = vcmp.eq.f32.partialorder %v344_v26, 8.507059e+37 }
  0x5a   :  { %v253_v5 = vsel %vm815_vm14, %v469_v36, %v249_v57 }
  0x5b   :  { %v475_v2 = vpop.eup %474  ;;  %v258_v15 = vsel %vm255_vm15, %v257_v4, %v253_v5 }
  0x5c   :  { %v291_v7 = vmul.f32 %v475_v2, %v289_v45  ;;  %vm296_vm1 = vweird.f32 %v475_v2  ;;  %v477_v3 = vpop.eup %476  ;;  %v366_v22 = vmul.f32 %v365_v1, %v258_v15 }
  0x5d   :  { %vm825_vm2 = vmor %vm295_vm0, %vm296_vm1  ;;  %v336_v21 = vmul.f32 %v477_v3, %v334_v60  ;;  %vm341_vm5 = vweird.f32 %v477_v3 }
  0x5e   :  { %v292_v13 = vsub.f32 1.0, %v291_v7  ;;  %v367_v28 = vadd.f32 %v366_v22, %v363_v19  ;;  %vm342_vm6 = vmor %vm340_vm4, %vm341_vm5 }
  0x5f   :  { %v337_v25 = vsub.f32 1.0, %v336_v21 }
  0x60   :  { %v293_v16 = vmul.f32 %v475_v2, %v292_v13 }
  0x61   :  { %v338_v17 = vmul.f32 %v477_v3, %v337_v25 }
  0x62   :  { %v294_v20 = vadd.f32 %v475_v2, %v293_v16 }
  0x63   :  { %v339_v31 = vadd.f32 %v477_v3, %v338_v17 }
  0x64   :  { %v298_v11 = vsel %vm825_vm2, %v475_v2, %v294_v20 }
  0x65   :  { %v303_v27 = vsel %vm300_vm3, %v302_v6, %v298_v11  ;;  %v343_v34 = vsel %vm342_vm6, %v477_v3, %v339_v31 }
  0x66   :  { %v370_v8 = vmul.f32 %v369_v24, %v303_v27  ;;  %v348_v29 = vsel %vm345_vm7, %v347_v30, %v343_v34 }
  0x67   :  { %v374_v32 = vmul.f32 %v373_v33, %v348_v29 }
  0x68   :  { %v371_v35 = vadd.f32 %v370_v8, %v367_v28 }
  0x6a   :  { %v375_v36 = vadd.f32 %v374_v32, %v371_v35 }
  0x6c   :  { %376 = vst [vmem:[#allocation11] sm:$0x1] %v375_v36 }
  0x6d   :  { %387 = dma.vmem_to_hbm [thread:$0]  %s383_s29, 16, %s385_s2, [#allocation5]  }
  0x6e   :  { %568 = dma.done.wait [#allocation5], 16  }
  0x6f   :  { %569 = vsyncadd [#allocation5], 4294967280 }
  0x70   :  { %392 = vsyncpa [#allocation4], 1 }
  0x71   :  { %393 = vsyncpa [#allocation5], 1 }
  0x72   :  { %394 = vsyncpa [#allocation6], 1 }
  0x73   :  { %395 = vsyncpa [#allocation9], 1 }

</bundles_post_ra>
